<compile_context>
chip_gen: v7x
topology: tpu7x:2x2x1
jax: 0.10.0
libtpu: 0.0.40
codegen_flags: <defaults>
</compile_context>

<pallas_src>
import math

import jax
import jax.numpy as jnp
from jax.experimental import pallas as pl
from jax.experimental.pallas import tpu as pltpu

# ---- logical (module) sizes ---------------------------------------------------------------
B = 2          # batch
NZ0 = 32       # miner input latent dim  (miner.nz0)
NZ = 64        # miner output / mapping z_dim
W_DIM = 64     # mapping w_dim
NUM_WS = 4     # number of ws the mapping broadcasts to
LR_MULT = 0.01 # StyleGAN2 mapping lr_multiplier

# ---- padded / tiled kernel sizes ----------------------------------------------------------
LANE = 128        # all feature dims zero-padded to one full lane width
SUBLANE = 8       # f32 sublane minimum for the batch (rows) dimension
B_TILE_MAX = 512  # rows per grid step for large batches (amortizes per-step overhead)
N_LINEAR = 4      # miner fc1, miner fc2, mapping fc1, mapping fc2


def minegan_kernel(z0_ref, w_ref, b_ref, out_ref):
    """Fused miner + mapping forward for one [rows, 128] batch tile.

    z0_ref : [rows, 128]       zero-padded z0, f32 (real features in [:, :NZ0])
    w_ref  : [4, 128, 128]     stacked, zero-padded, pre-scaled weights, bf16 ([in, out] layout;
                               mapping layers already include the sqrt(2) lrelu gain)
    b_ref  : [4, 128]          stacked, zero-padded, pre-scaled biases, f32
    out_ref: [rows, 128]       w (pre num_ws broadcast), real features in [:, :W_DIM]
    """
    x = z0_ref[...]

    # ---- Miner: Linear -> ReLU -> Linear (bf16 MXU operands, f32 accumulation) -------------
    x = jnp.dot(x.astype(jnp.bfloat16), w_ref[0],
                preferred_element_type=jnp.float32) + b_ref[0:1, :]
    x = jnp.maximum(x, 0.0)
    z = jnp.dot(x.astype(jnp.bfloat16), w_ref[1],
                preferred_element_type=jnp.float32) + b_ref[1:2, :]

    # ---- Gmapping: normalize 2nd moment of z (kept entirely in f32) ------------------------
    # Padded lanes of z are exactly zero (zero-padded weights/biases), so summing all 128 lanes
    # and dividing by the real NZ reproduces mean(z^2, axis=-1) exactly.
    mean_sq = jnp.sum(z * z, axis=-1, keepdims=True) * jnp.float32(1.0 / NZ)
    x = z * jax.lax.rsqrt(mean_sq + 1e-8)

    # ---- Mapping FC layers: lrelu(y, 0.2) * sqrt(2) with the gain folded into W/b ----------
    for i in (2, 3):
        x = jnp.dot(x.astype(jnp.bfloat16), w_ref[i],
                    preferred_element_type=jnp.float32) + b_ref[i:i + 1, :]
        x = jnp.maximum(x, 0.2 * x)          # leaky ReLU; gain already in the weights

    # Lane-dense 2-D store; num_ws broadcast happens outside the kernel.
    out_ref[...] = x.astype(out_ref.dtype)


def _batch_tiling(b):
    """Pick (padded batch, rows per grid step, number of grid steps) for a static batch size."""
    b_pad = max(pl.cdiv(b, SUBLANE) * SUBLANE, SUBLANE)
    if b_pad <= B_TILE_MAX:
        return b_pad, b_pad, 1                      # single full-array block, no grid waste
    b_tile = B_TILE_MAX
    b_pad = pl.cdiv(b, b_tile) * b_tile
    return b_pad, b_tile, b_pad // b_tile


@jax.jit
def minegan_forward(z0, packed_w, packed_b):
    """z0: [B, NZ0] float32  ->  w: [B, NUM_WS, W_DIM] float32."""
    b = z0.shape[0]
    b_pad, b_tile, n_tiles = _batch_tiling(b)

    # Zero-pad batch rows and input features (layout plumbing only; fused under jit).
    z0_p = jnp.zeros((b_pad, LANE), jnp.float32).at[:b, :NZ0].set(z0)

    cost = pl.CostEstimate(
        flops=2 * b_pad * LANE * LANE * N_LINEAR,
        transcendentals=b_pad,                                     # one rsqrt per row
        bytes_accessed=(b_pad * LANE * 4                           # z0 tile in
                        + N_LINEAR * LANE * LANE * 2               # bf16 weight stack
                        + N_LINEAR * LANE * 4                      # f32 bias stack
                        + b_pad * LANE * 4),                       # output
    )

    out = pl.pallas_call(
        minegan_kernel,
        out_shape=jax.ShapeDtypeStruct((b_pad, LANE), jnp.float32),
        grid=(n_tiles,),
        in_specs=[
            pl.BlockSpec((b_tile, LANE), lambda i: (i, 0)),             # batch tile
            pl.BlockSpec((N_LINEAR, LANE, LANE), lambda i: (0, 0, 0)),  # weights: VMEM-resident
            pl.BlockSpec((N_LINEAR, LANE), lambda i: (0, 0)),           # biases:  VMEM-resident
        ],
        out_specs=pl.BlockSpec((b_tile, LANE), lambda i: (i, 0)),
        compiler_params=pltpu.CompilerParams(
            # Only engages the 2nd TensorCore on v7x when n_tiles >= 2 (large batches);
            # harmless no-op for the single-step small-batch case.
            dimension_semantics=("parallel",)),
        cost_estimate=cost,
    )(z0_p, packed_w, packed_b)

    x = out[:b, :W_DIM]
    # w = x.unsqueeze(1).repeat([1, num_ws, 1]) -- free broadcast in XLA, fused under jit.
    return jnp.broadcast_to(x[:, None, :], (b, NUM_WS, W_DIM))


def init_params(key):
    """Deterministic synthetic parameters, pre-scaled (equalized lr + lrelu gain) and packed."""
    ks = jax.random.split(key, 6)

    # Miner: Linear(NZ0, NZ) -> ReLU -> Linear(NZ, NZ). Stored transposed as [in, out].
    mw1 = jax.random.normal(ks[0], (NZ0, NZ), jnp.float32) * (1.0 / math.sqrt(NZ0))
    mb1 = jax.random.normal(ks[1], (NZ,), jnp.float32) * 0.01
    mw2 = jax.random.normal(ks[2], (NZ, NZ), jnp.float32) * (1.0 / math.sqrt(NZ))
    mb2 = jax.random.normal(ks[3], (NZ,), jnp.float32) * 0.01

    # StyleGAN2 FullyConnectedLayer (equalized lr):
    #   raw weight ~ N(0,1)/lr_mult, raw bias = 0
    #   effective weight = raw * lr_mult / sqrt(fan_in), effective bias = raw * lr_mult
    # The lrelu output gain sqrt(2) is folded in here (lrelu(g*y) == g*lrelu(y) for g > 0),
    # so the kernel only needs jnp.maximum(x, 0.2*x).
    gain = math.sqrt(2.0)

    def fc(kw, fan_in, fan_out):
        w_raw = jax.random.normal(kw, (fan_in, fan_out), jnp.float32) / LR_MULT
        b_raw = jnp.zeros((fan_out,), jnp.float32)
        w_eff = w_raw * (LR_MULT / math.sqrt(fan_in)) * gain
        b_eff = b_raw * LR_MULT * gain
        return w_eff, b_eff

    gw1, gb1 = fc(ks[4], NZ, W_DIM)
    gw2, gb2 = fc(ks[5], W_DIM, W_DIM)

    # Zero-pad every layer to [128, 128] / [128] and stack -> 2 DMAs total.
    def pad_w(w):
        return jnp.zeros((LANE, LANE), jnp.float32).at[:w.shape[0], :w.shape[1]].set(w)

    def pad_b(bv):
        return jnp.zeros((LANE,), jnp.float32).at[:bv.shape[0]].set(bv)

    # Weights in bf16 for the MXU (halves the parameter DMA); biases stay f32 (added post-accum).
    packed_w = jnp.stack([pad_w(mw1), pad_w(mw2), pad_w(gw1), pad_w(gw2)]).astype(jnp.bfloat16)
    packed_b = jnp.stack([pad_b(mb1), pad_b(mb2), pad_b(gb1), pad_b(gb2)])   # [4, 128] f32

    # TODO(synk): the real Gmapping has 8 FC layers + w_avg/truncation buffers; truncation_psi=1
    # and eval-mode w_avg update are identity at inference, so they are omitted here.
    return packed_w, packed_b


if __name__ == "__main__":
    key = jax.random.PRNGKey(0)
    k_z, k_p = jax.random.split(key)

    z0 = jax.random.normal(k_z, (B, NZ0), jnp.float32)
    packed_w, packed_b = init_params(k_p)

    w = minegan_forward(z0, packed_w, packed_b)
    w = jax.block_until_ready(w)

    assert w.shape == (B, NUM_WS, W_DIM), w.shape
    assert w.dtype == jnp.float32
    # all num_ws slices must be identical (broadcast semantics)
    assert bool(jnp.allclose(w[:, 0, :], w[:, 1, :]))
    # finite sanity check
    assert bool(jnp.all(jnp.isfinite(w)))

    print("KERNEL_OK")
</pallas_src>

<mosaic_0001>
module attributes {stable_mosaic.version = 11 : i64} {
  func.func @minegan_kernel(%arg0: i32, %arg1: memref<8x128xf32, #tpu.memory_space<vmem>>, %arg2: memref<4x128x128xbf16, #tpu.memory_space<vmem>>, %arg3: memref<4x128xf32, #tpu.memory_space<vmem>>, %arg4: memref<8x128xf32, #tpu.memory_space<vmem>>) attributes {dimension_semantics = [#tpu.dimension_semantics<parallel>], iteration_bounds = array<i64: 1>, scalar_prefetch = 0 : i64, scratch_operands = 0 : i64, tpu.core_type = #tpu.core_type<tc>, window_params = [{transform_indices = @transform_0, window_bounds = array<i64: 8, 128>}, {pipeline_mode = #tpu.pipeline_mode<synchronous>, transform_indices = @transform_1, window_bounds = array<i64: 4, 128, 128>}, {pipeline_mode = #tpu.pipeline_mode<synchronous>, transform_indices = @transform_2, window_bounds = array<i64: 4, 128>}, {transform_indices = @transform_3, window_bounds = array<i64: 8, 128>}]} {
    %c0 = arith.constant 0 : index
    %c0_0 = arith.constant 0 : index
    %0 = vector.load %arg1[%c0, %c0_0] : memref<8x128xf32, #tpu.memory_space<vmem>>, vector<8x128xf32>
    %1 = arith.truncf %0 : vector<8x128xf32> to vector<8x128xbf16>
    %c0_1 = arith.constant 0 : index
    %c0_2 = arith.constant 0 : index
    %c0_3 = arith.constant 0 : index
    %2 = vector.load %arg2[%c0_1, %c0_2, %c0_3] : memref<4x128x128xbf16, #tpu.memory_space<vmem>>, vector<1x128x128xbf16>
    %3 = vector.shape_cast %2 : vector<1x128x128xbf16> to vector<128x128xbf16>
    %cst = arith.constant dense<0.000000e+00> : vector<8x128xf32>
    %4 = tpu.matmul %1, %3, %cst {dimension_numbers = #tpu.dot_dimension_numbers<[1], [0], [0], [1], [0, 0, 1, 1], [], []>} : vector<8x128xbf16>, vector<128x128xbf16>, vector<8x128xf32> -> vector<8x128xf32>
    %c0_4 = arith.constant 0 : index
    %c0_5 = arith.constant 0 : index
    %5 = vector.load %arg3[%c0_4, %c0_5] : memref<4x128xf32, #tpu.memory_space<vmem>>, vector<1x128xf32>
    %6 = vector.broadcast %5 : vector<1x128xf32> to vector<8x128xf32>
    %7 = arith.addf %4, %6 : vector<8x128xf32>
    %cst_6 = arith.constant 0.000000e+00 : f32
    %8 = vector.broadcast %cst_6 : f32 to vector<8x128xf32>
    %9 = arith.maximumf %7, %8 : vector<8x128xf32>
    %10 = arith.truncf %9 : vector<8x128xf32> to vector<8x128xbf16>
    %c1 = arith.constant 1 : index
    %c0_7 = arith.constant 0 : index
    %c0_8 = arith.constant 0 : index
    %11 = vector.load %arg2[%c1, %c0_7, %c0_8] : memref<4x128x128xbf16, #tpu.memory_space<vmem>>, vector<1x128x128xbf16>
    %12 = vector.shape_cast %11 : vector<1x128x128xbf16> to vector<128x128xbf16>
    %cst_9 = arith.constant dense<0.000000e+00> : vector<8x128xf32>
    %13 = tpu.matmul %10, %12, %cst_9 {dimension_numbers = #tpu.dot_dimension_numbers<[1], [0], [0], [1], [0, 0, 1, 1], [], []>} : vector<8x128xbf16>, vector<128x128xbf16>, vector<8x128xf32> -> vector<8x128xf32>
    %c1_10 = arith.constant 1 : index
    %c0_11 = arith.constant 0 : index
    %14 = vector.load %arg3[%c1_10, %c0_11] : memref<4x128xf32, #tpu.memory_space<vmem>>, vector<1x128xf32>
    %15 = vector.broadcast %14 : vector<1x128xf32> to vector<8x128xf32>
    %16 = arith.addf %13, %15 : vector<8x128xf32>
    %17 = arith.mulf %16, %16 : vector<8x128xf32>
    %cst_12 = arith.constant dense<0.000000e+00> : vector<8xf32>
    %18 = vector.multi_reduction <add>, %17, %cst_12 [1] : vector<8x128xf32> to vector<8xf32>
    %19 = vector.shape_cast %18 : vector<8xf32> to vector<8x1xf32>
    %cst_13 = arith.constant 1.562500e-02 : f32
    %20 = vector.broadcast %cst_13 : f32 to vector<8x1xf32>
    %21 = arith.mulf %19, %20 : vector<8x1xf32>
    %cst_14 = arith.constant 9.99999993E-9 : f32
    %22 = vector.broadcast %cst_14 : f32 to vector<8x1xf32>
    %23 = arith.addf %21, %22 : vector<8x1xf32>
    %24 = math.rsqrt %23 : vector<8x1xf32>
    %25 = vector.broadcast %24 : vector<8x1xf32> to vector<8x128xf32>
    %26 = arith.mulf %16, %25 : vector<8x128xf32>
    %27 = arith.truncf %26 : vector<8x128xf32> to vector<8x128xbf16>
    %c2 = arith.constant 2 : index
    %c0_15 = arith.constant 0 : index
    %c0_16 = arith.constant 0 : index
    %28 = vector.load %arg2[%c2, %c0_15, %c0_16] : memref<4x128x128xbf16, #tpu.memory_space<vmem>>, vector<1x128x128xbf16>
    %29 = vector.shape_cast %28 : vector<1x128x128xbf16> to vector<128x128xbf16>
    %cst_17 = arith.constant dense<0.000000e+00> : vector<8x128xf32>
    %30 = tpu.matmul %27, %29, %cst_17 {dimension_numbers = #tpu.dot_dimension_numbers<[1], [0], [0], [1], [0, 0, 1, 1], [], []>} : vector<8x128xbf16>, vector<128x128xbf16>, vector<8x128xf32> -> vector<8x128xf32>
    %c2_18 = arith.constant 2 : index
    %c0_19 = arith.constant 0 : index
    %31 = vector.load %arg3[%c2_18, %c0_19] : memref<4x128xf32, #tpu.memory_space<vmem>>, vector<1x128xf32>
    %32 = vector.broadcast %31 : vector<1x128xf32> to vector<8x128xf32>
    %33 = arith.addf %30, %32 : vector<8x128xf32>
    %cst_20 = arith.constant 2.000000e-01 : f32
    %34 = vector.broadcast %cst_20 : f32 to vector<8x128xf32>
    %35 = arith.mulf %34, %33 : vector<8x128xf32>
    %36 = arith.maximumf %33, %35 : vector<8x128xf32>
    %37 = arith.truncf %36 : vector<8x128xf32> to vector<8x128xbf16>
    %c3 = arith.constant 3 : index
    %c0_21 = arith.constant 0 : index
    %c0_22 = arith.constant 0 : index
    %38 = vector.load %arg2[%c3, %c0_21, %c0_22] : memref<4x128x128xbf16, #tpu.memory_space<vmem>>, vector<1x128x128xbf16>
    %39 = vector.shape_cast %38 : vector<1x128x128xbf16> to vector<128x128xbf16>
    %cst_23 = arith.constant dense<0.000000e+00> : vector<8x128xf32>
    %40 = tpu.matmul %37, %39, %cst_23 {dimension_numbers = #tpu.dot_dimension_numbers<[1], [0], [0], [1], [0, 0, 1, 1], [], []>} : vector<8x128xbf16>, vector<128x128xbf16>, vector<8x128xf32> -> vector<8x128xf32>
    %c3_24 = arith.constant 3 : index
    %c0_25 = arith.constant 0 : index
    %41 = vector.load %arg3[%c3_24, %c0_25] : memref<4x128xf32, #tpu.memory_space<vmem>>, vector<1x128xf32>
    %42 = vector.broadcast %41 : vector<1x128xf32> to vector<8x128xf32>
    %43 = arith.addf %40, %42 : vector<8x128xf32>
    %cst_26 = arith.constant 2.000000e-01 : f32
    %44 = vector.broadcast %cst_26 : f32 to vector<8x128xf32>
    %45 = arith.mulf %44, %43 : vector<8x128xf32>
    %46 = arith.maximumf %43, %45 : vector<8x128xf32>
    %c0_27 = arith.constant 0 : index
    %c0_28 = arith.constant 0 : index
    %47 = vector.load %arg4[%c0_27, %c0_28] : memref<8x128xf32, #tpu.memory_space<vmem>>, vector<8x128xf32>
    tpu.vector_store %arg4[%c0_27, %c0_28], %46 {strides = array<i32>} : memref<8x128xf32, #tpu.memory_space<vmem>>, vector<8x128xf32>,
    return
  }
  func.func @transform_0(%arg0: i32) -> (i32, i32) {
    %c0_i32 = arith.constant 0 : i32
    %c0_i32_0 = arith.constant 0 : i32
    return %arg0, %c0_i32 : i32, i32
  }
  func.func @transform_1(%arg0: i32) -> (i32, i32, i32) {
    %c0_i32 = arith.constant 0 : i32
    %c0_i32_0 = arith.constant 0 : i32
    %c0_i32_1 = arith.constant 0 : i32
    %c0_i32_2 = arith.constant 0 : i32
    return %c0_i32, %c0_i32_0, %c0_i32_1 : i32, i32, i32
  }
  func.func @transform_2(%arg0: i32) -> (i32, i32) {
    %c0_i32 = arith.constant 0 : i32
    %c0_i32_0 = arith.constant 0 : i32
    %c0_i32_1 = arith.constant 0 : i32
    return %c0_i32, %c0_i32_0 : i32, i32
  }
  func.func @transform_3(%arg0: i32) -> (i32, i32) {
    %c0_i32 = arith.constant 0 : i32
    %c0_i32_0 = arith.constant 0 : i32
    return %arg0, %c0_i32 : i32, i32
  }
}

</mosaic_0001>

<bundles_post_ra>
// kernel: minegan_forward.1
= control target key start
LH: loop header
LB: loop body
LE: loop exit
PB: predicated region body
PF: predicated region fallthrough
CT: control target
= control target key end

     0   :  { %8 = vsyncpa [#allocation3], 0  ;;  %s706_s12 = smov [#allocation2]   ;;  %s801_s0 = inlined_call_operand.vmem [shape: f32[8,128], index: 0, kind: input, shape index: {}]   ;;  %s802_s1 = inlined_call_operand.hbm [shape: bf16[4,128,128], index: 1, kind: input, shape index: {}]   ;;  %s803_s2 = inlined_call_operand.vmem [shape: f32[4,128], index: 2, kind: input, shape index: {}]   ;;  %s804_s3 = inlined_call_operand.vmem [shape: f32[8,128], index: 3, kind: output, shape index: {}]  }
   0x1   :  { %s16_s13 = sshll.u32 %s706_s12, 4  ;;  %s682_s16 = scalar_lea.hbm %s802_s1, 4096  ;;  %s17_s13 = int_to_ptr.vmem [resolvable:$true] %s16_s13 }
   0x2   :  { %p683_p0 = scmp.ne.s32.totalorder %s802_s1, %s682_s16  ;;  %p686_p1 = scmp.lt.u32.totalorder %s682_s16, %s802_s1 }
   0x4   :  { %p688_p2 = pnand %p686_p1, %p683_p0 }
   0x6   :  { %691 = shalt.err (!%p688_p2)
}
   0x7   :  { %s692_s21 = scalar_lea.vmem %s17_s13, 4096  ;;  %p697_p4 = scmp.lt.s32.totalorder %s17_s13, %s17_s13 }
   0x8   :  { %p693_p3 = scmp.ne.s32.totalorder %s17_s13, %s692_s21  ;;  %p698_p5 = scmp.lt.s32.totalorder %s692_s21, %s692_s21 }
   0xa   :  { %p699_p6 = por %p698_p5, %p697_p4 }
   0xc   :  { %p700_p7 = pnand %p699_p6, %p693_p3 }
   0xe   :  { %703 = shalt.err (!%p700_p7)
}
   0xf   :  { %s707_s22 = smov 64   ;;  %s708_s23 = smov 4  }
  0x10   :  { %22 = dma.hbm_to_vmem [thread:$0]  %s802_s1, 4096, %s17_s13, [#allocation3], %s707_s22, %s707_s22, %s708_s23  }
  0x11   :  { %704 = dma.done.wait [#allocation3], 4096  }
  0x12   :  { %705 = vsyncadd [#allocation3], 4294963200  ;;  %v709_v0 = vmov 0.0   ;;  %vm710_vm0 = vmmov 0   ;;  %v648_v1 = vld [vmem:[#allocation2] sm:$0xff]   ;;  %v649_v2 = vld [vmem:[#allocation2 + $0x8] sm:$0xff]  }
  0x13   :  { %563 = vmatprep.subr.bf16.mxu0 %v709_v0  ;;  %579 = vmatprep.mubr.msk.bf16.mxu0 %vm710_vm0, %v709_v0  ;;  %v650_v3 = vld [vmem:[#allocation2 + $0x10] sm:$0xff]   ;;  %v656_v4 = vld [vmem:[#allocation2 + $0x40] sm:$0xff]   ;;  %v651_v5 = vld [vmem:[#allocation2 + $0x18] sm:$0xff]  }
  0x14   :  { %583 = vmatprep.subr.bf16.mxu1 %v709_v0  ;;  %599 = vmatprep.mubr.msk.bf16.mxu1 %vm710_vm0, %v709_v0  ;;  %v657_v6 = vld [vmem:[#allocation2 + $0x48] sm:$0xff]   ;;  %v652_v7 = vld [vmem:[#allocation2 + $0x20] sm:$0xff]   ;;  %v658_v8 = vld [vmem:[#allocation2 + $0x50] sm:$0xff]  }
  0x15   :  { %564 = vmatpush3.bf16.msra.mxu0 %v648_v1  ;;  %584 = vmatpush3.bf16.msra.mxu1 %v656_v4  ;;  %v653_v9 = vld [vmem:[#allocation2 + $0x28] sm:$0xff]   ;;  %v659_v10 = vld [vmem:[#allocation2 + $0x58] sm:$0xff]   ;;  %v654_v11 = vld [vmem:[#allocation2 + $0x30] sm:$0xff]  }
  0x16   :  { %565 = vmatprep.subr.bf16.mxu0 %v709_v0  ;;  %585 = vmatprep.subr.bf16.mxu1 %v709_v0  ;;  %v660_v12 = vld [vmem:[#allocation2 + $0x60] sm:$0xff]   ;;  %v655_v13 = vld [vmem:[#allocation2 + $0x38] sm:$0xff]   ;;  %v661_v15 = vld [vmem:[#allocation2 + $0x68] sm:$0xff]  }
  0x17   :  { %v29_v14 = vld [vmem:[%s801_s0] sm:$0xff]  ;;  %v662_v17 = vld [vmem:[#allocation2 + $0x70] sm:$0xff]   ;;  %v663_v18 = vld [vmem:[#allocation2 + $0x78] sm:$0xff]  }
  0x18   :  { %v30_v16 = vpack.c.bf16 %v29_v14, %v29_v14  ;;  %v491_v19 = vld [vmem:[%s803_s2] ss:$0 sm:$0xff]  ;;  %v665_v28 = vld [vmem:[#allocation2 + $0x88] sm:$0xff]   ;;  %v666_v29 = vld [vmem:[#allocation2 + $0x90] sm:$0xff]  }
  0x19   :  { %566 = vmatpush3.bf16.msra.mxu0 %v649_v2  ;;  %586 = vmatpush3.bf16.msra.mxu1 %v657_v6  ;;  %v664_v27 = vld [vmem:[#allocation2 + $0x80] sm:$0xff]   ;;  %v667_v37 = vld [vmem:[#allocation2 + $0x98] sm:$0xff]   ;;  %v669_v39 = vld [vmem:[#allocation2 + $0xa8] sm:$0xff]  }
  0x1a   :  { %567 = vmatprep.subr.bf16.mxu0 %v709_v0  ;;  %587 = vmatprep.subr.bf16.mxu1 %v709_v0  ;;  %v500_v30 = vld [vmem:[%s803_s2 + $0x1] ss:$0 sm:$0xff]  ;;  %v670_v40 = vld [vmem:[#allocation2 + $0xb0] sm:$0xff]   ;;  %v671_v41 = vld [vmem:[#allocation2 + $0xb8] sm:$0xff]  }
  0x1b   :  { %v668_v38 = vld [vmem:[#allocation2 + $0xa0] sm:$0xff]   ;;  %v673_v43 = vld [vmem:[#allocation2 + $0xc8] sm:$0xff]   ;;  %v674_v44 = vld [vmem:[#allocation2 + $0xd0] sm:$0xff]  }
  0x1c   :  { %v672_v42 = vld [vmem:[#allocation2 + $0xc0] sm:$0xff]   ;;  %v675_v45 = vld [vmem:[#allocation2 + $0xd8] sm:$0xff]   ;;  %v677_v47 = vld [vmem:[#allocation2 + $0xe8] sm:$0xff]  }
  0x1d   :  { %568 = vmatpush3.bf16.msra.mxu0 %v650_v3  ;;  %588 = vmatpush3.bf16.msra.mxu1 %v658_v8  ;;  %v676_v46 = vld [vmem:[#allocation2 + $0xe0] sm:$0xff]   ;;  %v678_v54 = vld [vmem:[#allocation2 + $0xf0] sm:$0xff]   ;;  %v679_v55 = vld [vmem:[#allocation2 + $0xf8] sm:$0xff]  }
  0x1e   :  { %569 = vmatprep.subr.bf16.mxu0 %v709_v0  ;;  %589 = vmatprep.subr.bf16.mxu1 %v709_v0  ;;  %v509_v56 = vld [vmem:[%s803_s2 + $0x2] ss:$0 sm:$0xff]  ;;  %v518_v2 = vld [vmem:[%s803_s2 + $0x3] ss:$0 sm:$0xff] }
  0x21   :  { %570 = vmatpush3.bf16.msra.mxu0 %v651_v5  ;;  %590 = vmatpush3.bf16.msra.mxu1 %v659_v10 }
  0x22   :  { %571 = vmatprep.subr.bf16.mxu0 %v709_v0  ;;  %591 = vmatprep.subr.bf16.mxu1 %v709_v0 }
  0x25   :  { %572 = vmatpush3.bf16.msra.mxu0 %v652_v7  ;;  %592 = vmatpush3.bf16.msra.mxu1 %v660_v12 }
  0x26   :  { %573 = vmatprep.subr.bf16.mxu0 %v709_v0  ;;  %593 = vmatprep.subr.bf16.mxu1 %v709_v0 }
  0x29   :  { %574 = vmatpush3.bf16.msra.mxu0 %v653_v9  ;;  %594 = vmatpush3.bf16.msra.mxu1 %v661_v15 }
  0x2a   :  { %575 = vmatprep.subr.bf16.mxu0 %v709_v0  ;;  %595 = vmatprep.subr.bf16.mxu1 %v709_v0 }
  0x2d   :  { %576 = vmatpush3.bf16.msra.mxu0 %v654_v11  ;;  %596 = vmatpush3.bf16.msra.mxu1 %v662_v17 }
  0x2e   :  { %577 = vmatprep.subr.bf16.mxu0 %v709_v0  ;;  %597 = vmatprep.subr.bf16.mxu1 %v709_v0 }
  0x31   :  { %578 = vmatpush3.bf16.msra.mxu0 %v655_v13  ;;  %598 = vmatpush3.bf16.msra.mxu1 %v663_v18 }
  0x32   :  { %603 = vmatprep.subr.bf16.mxu0 %v709_v0  ;;  %623 = vmatprep.subr.bf16.mxu1 %v709_v0 }
  0x34   :  { %580 = vmatmul.mubr.bf16.vlgmr.msra.gmra.mrb[0].mxu0 %v30_v16 }
  0x35   :  { %619 = vmatprep.mubr.msk.bf16.mxu0 %vm710_vm0, %v709_v0  ;;  %604 = vmatpush3.bf16.msra.mxu0 %v664_v27 }
  0x36   :  { %605 = vmatprep.subr.bf16.mxu0 %v709_v0 }
  0x39   :  { %606 = vmatpush3.bf16.msra.mxu0 %v665_v28 }
  0x3a   :  { %607 = vmatprep.subr.bf16.mxu0 %v709_v0 }
  0x3d   :  { %608 = vmatpush3.bf16.msra.mxu0 %v666_v29 }
  0x3e   :  { %609 = vmatprep.subr.bf16.mxu0 %v709_v0 }
  0x41   :  { %610 = vmatpush3.bf16.msra.mxu0 %v667_v37 }
  0x42   :  { %611 = vmatprep.subr.bf16.mxu0 %v709_v0 }
  0x45   :  { %612 = vmatpush3.bf16.msra.mxu0 %v668_v38 }
  0x46   :  { %613 = vmatprep.subr.bf16.mxu0 %v709_v0 }
  0x49   :  { %614 = vmatpush3.bf16.msra.mxu0 %v669_v39 }
  0x4a   :  { %615 = vmatprep.subr.bf16.mxu0 %v709_v0 }
  0x4d   :  { %616 = vmatpush3.bf16.msra.mxu0 %v670_v40 }
  0x4e   :  { %617 = vmatprep.subr.bf16.mxu0 %v709_v0 }
  0x51   :  { %618 = vmatpush3.bf16.msra.mxu0 %v671_v41 }
 0x107   :  { %v134_v20 = vpop.f32.mrb[0].mxu0 }
 0x108   :  { %v135_v21 = vadd.f32 %v491_v19, %v134_v20  ;;  %v581_v22 = vpop.f32.mrb[1].mxu0 }
 0x109   :  { %v137_v23 = vpop.f32.mrb[2].mxu0 }
 0x10a   :  { %v140_v24 = vmax.f32 %v135_v21, 0.0  ;;  %v582_v25 = vpop.f32.mrb[3].mxu0 }
 0x10c   :  { %v141_v26 = vpack.c.bf16 %v140_v24, %v140_v24 }
 0x10e   :  { %600 = vmatmul.mubr.bf16.vlgmr.msra.gmra.mrb[0].mxu1 %v141_v26 }
 0x10f   :  { %639 = vmatprep.mubr.msk.bf16.mxu1 %vm710_vm0, %v709_v0  ;;  %624 = vmatpush3.bf16.msra.mxu1 %v672_v42 }
 0x110   :  { %625 = vmatprep.subr.bf16.mxu1 %v709_v0 }
 0x113   :  { %626 = vmatpush3.bf16.msra.mxu1 %v673_v43 }
 0x114   :  { %627 = vmatprep.subr.bf16.mxu1 %v709_v0 }
 0x117   :  { %628 = vmatpush3.bf16.msra.mxu1 %v674_v44 }
 0x118   :  { %629 = vmatprep.subr.bf16.mxu1 %v709_v0 }
 0x11b   :  { %630 = vmatpush3.bf16.msra.mxu1 %v675_v45 }
 0x11c   :  { %631 = vmatprep.subr.bf16.mxu1 %v709_v0 }
 0x11f   :  { %632 = vmatpush3.bf16.msra.mxu1 %v676_v46 }
 0x120   :  { %633 = vmatprep.subr.bf16.mxu1 %v709_v0 }
 0x123   :  { %634 = vmatpush3.bf16.msra.mxu1 %v677_v47 }
 0x124   :  { %635 = vmatprep.subr.bf16.mxu1 %v709_v0 }
 0x127   :  { %636 = vmatpush3.bf16.msra.mxu1 %v678_v54 }
 0x128   :  { %637 = vmatprep.subr.bf16.mxu1 %v709_v0 }
 0x12b   :  { %638 = vmatpush3.bf16.msra.mxu1 %v679_v55 }
 0x1e1   :  { %v246_v31 = vpop.f32.mrb[0].mxu1 }
 0x1e2   :  { %v247_v32 = vadd.f32 %v500_v30, %v246_v31  ;;  %v601_v33 = vpop.f32.mrb[1].mxu1 }
 0x1e3   :  { %v249_v34 = vpop.f32.mrb[2].mxu1 }
 0x1e4   :  { %v602_v35 = vpop.f32.mrb[3].mxu1  ;;  %v252_v36 = vmul.f32 %v247_v32, %v247_v32 }
 0x1e6   :  { %253 = vadd.xlane.f32.xlu0 %v252_v36 }
 0x273   :  { %v254_v48 = vpop.xlane.xlu0 %253 }
 0x274   :  { %v255_v49 = vmul.f32 0.015625, %v254_v48 }
 0x276   :  { %v256_v50 = vadd.f32 1e-08, %v255_v49 }
 0x278   :  { %680 = vrsqrt.f32 %v256_v50 }
 0x282   :  { %v681_v51 = vpop.eup %680 }
 0x283   :  { %v258_v52 = vmul.f32 %v681_v51, %v247_v32 }
 0x285   :  { %v259_v53 = vpack.c.bf16 %v258_v52, %v258_v52 }
 0x287   :  { %620 = vmatmul.mubr.bf16.vlgmr.msra.gmra.mrb[4].mxu0 %v259_v53 }
 0x35a   :  { %v364_v57 = vpop.f32.mrb[4].mxu0 }
 0x35b   :  { %v365_v58 = vadd.f32 %v509_v56, %v364_v57  ;;  %v621_v59 = vpop.f32.mrb[5].mxu0 }
 0x35c   :  { %v367_v60 = vpop.f32.mrb[6].mxu0 }
 0x35d   :  { %v370_v61 = vmul.f32 0.2, %v365_v58  ;;  %v622_v62 = vpop.f32.mrb[7].mxu0 }
 0x35f   :  { %v371_v63 = vmax.f32 %v365_v58, %v370_v61 }
 0x361   :  { %v372_v1 = vpack.c.bf16 %v371_v63, %v371_v63 }
 0x363   :  { %640 = vmatmul.mubr.bf16.vlgmr.msra.gmra.mrb[4].mxu1 %v372_v1 }
 0x436   :  { %v477_v0 = vpop.f32.mrb[4].mxu1 }
 0x437   :  { %v478_v3 = vadd.f32 %v518_v2, %v477_v0  ;;  %v641_v4 = vpop.f32.mrb[5].mxu1 }
 0x438   :  { %v480_v5 = vpop.f32.mrb[6].mxu1 }
 0x439   :  { %v483_v6 = vmul.f32 0.2, %v478_v3  ;;  %v642_v7 = vpop.f32.mrb[7].mxu1 }
 0x43b   :  { %v484_v8 = vmax.f32 %v478_v3, %v483_v6 }
 0x43d   :  { %485 = vst [vmem:[%s804_s3] sm:$0xff] %v484_v8 }
 0x43e   :  { %490 = vsyncpa [#allocation3], 1 }

</bundles_post_ra>
